<compile_context>
chip_gen: v7x
topology: tpu7x:2x2x1
jax: 0.10.0
libtpu: 0.0.40
codegen_flags: <defaults>
</compile_context>

<pallas_src>
import functools

import jax
import jax.numpy as jnp
from jax.experimental import pallas as pl
from jax.experimental.pallas import tpu as pltpu

LANE = 128      # TPU vreg lane width
SUBLANE = 8     # TPU vreg sublane count (f32)
TM_MAX = 512    # batch-tile rows; >=512-row tiles sit near the HBM roofline


def _round_up(n, m):
    return ((n + m - 1) // m) * m


# ----------------------------------------------------------------------------
# Kernel: whole 4-layer forward for one batch tile.
# ----------------------------------------------------------------------------
def autoencoder_kernel(x_ref,
                       w1_ref, b1_ref,
                       w2_ref, b2_ref,
                       w3_ref, b3_ref,
                       w4_ref, b4_ref,
                       enc_ref, dec_ref):
    """encoder: sigmoid(sigmoid(x@W1+b1)@W2+b2); decoder mirrors with W3/W4."""
    x = x_ref[...].astype(jnp.bfloat16)

    h1 = jax.nn.sigmoid(
        jnp.dot(x, w1_ref[...], preferred_element_type=jnp.float32) + b1_ref[...])
    enc = jax.nn.sigmoid(
        jnp.dot(h1.astype(jnp.bfloat16), w2_ref[...],
                preferred_element_type=jnp.float32) + b2_ref[...])
    h2 = jax.nn.sigmoid(
        jnp.dot(enc.astype(jnp.bfloat16), w3_ref[...],
                preferred_element_type=jnp.float32) + b3_ref[...])
    dec = jax.nn.sigmoid(
        jnp.dot(h2.astype(jnp.bfloat16), w4_ref[...],
                preferred_element_type=jnp.float32) + b4_ref[...])

    enc_ref[...] = enc.astype(enc_ref.dtype)
    dec_ref[...] = dec.astype(dec_ref.dtype)


# ----------------------------------------------------------------------------
# Wrapper
# ----------------------------------------------------------------------------
@functools.partial(jax.jit, static_argnames=("latent_dim", "output_dim"))
def autoencoder_forward(x, kernel_params, *, latent_dim, output_dim):
    """Returns (encoded, decoded) matching AutoEncoder.forward semantics.

    `kernel_params` are the lane-padded bf16 weights / f32 biases produced by
    `prepare_kernel_params`.
    """
    w1, b1, w2, b2, w3, b3, w4, b4 = kernel_params
    batch, in_dim = x.shape
    ip = w1.shape[0]          # padded input dim
    hp = w1.shape[1]          # padded hidden dim
    lp = w2.shape[1]          # padded latent dim
    op = w4.shape[1]          # padded output dim

    # Lane-pad the input feature dim so x loads / the W1 matmul are lane-dense.
    if ip != in_dim:
        x = jnp.pad(x, ((0, 0), (0, ip - in_dim)))

    # Batch tile: as large as reasonable, multiple of 8 sublanes.
    tm = min(TM_MAX, _round_up(batch, SUBLANE))
    b_pad = _round_up(batch, tm)
    if b_pad != batch:
        x = jnp.pad(x, ((0, b_pad - batch), (0, 0)))
    grid = (b_pad // tm,)

    # VMEM budget (bytes): double-buffered I/O tiles + resident weights + slack.
    weight_bytes = (ip * hp + hp * lp + lp * hp + hp * op) * 2          # bf16
    bias_bytes = (hp + lp + hp + op) * 4                                # f32
    io_bytes = tm * (ip + lp + op) * 4                                  # f32 tiles
    interm_bytes = tm * (3 * hp + lp + op) * 4                          # h1/h2/bf16 copies
    vmem_needed = 2 * (weight_bytes + bias_bytes + io_bytes) + interm_bytes
    vmem_limit = int(min(64 * 1024 * 1024,
                         max(vmem_needed + (8 << 20), 32 * 1024 * 1024)))

    def full(a):
        nd = a.ndim
        return pl.BlockSpec(a.shape, lambda i, _nd=nd: (0,) * _nd)

    enc_pad, dec_pad = pl.pallas_call(
        autoencoder_kernel,
        out_shape=(jax.ShapeDtypeStruct((b_pad, lp), jnp.float32),
                   jax.ShapeDtypeStruct((b_pad, op), jnp.float32)),
        grid=grid,
        in_specs=[
            pl.BlockSpec((tm, ip), lambda i: (i, 0)),   # x: batch-tiled
            full(w1), full(b1),
            full(w2), full(b2),
            full(w3), full(b3),
            full(w4), full(b4),
        ],
        out_specs=(pl.BlockSpec((tm, lp), lambda i: (i, 0)),
                   pl.BlockSpec((tm, op), lambda i: (i, 0))),
        compiler_params=pltpu.CompilerParams(
            dimension_semantics=("parallel",),
            vmem_limit_bytes=vmem_limit),
    )(x, w1, b1, w2, b2, w3, b3, w4, b4)

    # Strip batch padding and lane padding back to the logical dims.
    return enc_pad[:batch, :latent_dim], dec_pad[:batch, :output_dim]


# ----------------------------------------------------------------------------
# Parameter construction (PyTorch nn.Linear-style init) + kernel-side packing.
# ----------------------------------------------------------------------------
def init_linear_params(key, in_features, out_features):
    """U[-1/sqrt(in), 1/sqrt(in)] like torch.nn.Linear; weight is (in, out)."""
    kw, kb = jax.random.split(key)
    bound = 1.0 / jnp.sqrt(jnp.float32(in_features))
    w = jax.random.uniform(kw, (in_features, out_features), jnp.float32, -bound, bound)
    b = jax.random.uniform(kb, (out_features,), jnp.float32, -bound, bound)
    return w, b


def make_autoencoder_params(key, input_dim, latent_dim, hidden_dim, output_dim):
    k1, k2, k3, k4 = jax.random.split(key, 4)
    w1, b1 = init_linear_params(k1, input_dim, hidden_dim)    # encoder layer 1
    w2, b2 = init_linear_params(k2, hidden_dim, latent_dim)   # encoder layer 2
    w3, b3 = init_linear_params(k3, latent_dim, hidden_dim)   # decoder layer 1
    w4, b4 = init_linear_params(k4, hidden_dim, output_dim)   # decoder layer 2
    return (w1, b1, w2, b2, w3, b3, w4, b4)


def prepare_kernel_params(params):
    """Zero-pad every feature dim to a multiple of 128 lanes; weights -> bf16."""
    w1, b1, w2, b2, w3, b3, w4, b4 = params
    in_dim, hidden = w1.shape
    latent = w2.shape[1]
    out = w4.shape[1]
    ip = _round_up(in_dim, LANE)
    hp = _round_up(hidden, LANE)
    lp = _round_up(latent, LANE)
    op = _round_up(out, LANE)

    def pad_w(w, rows_to, cols_to):
        r, c = w.shape
        return jnp.pad(w, ((0, rows_to - r), (0, cols_to - c))).astype(jnp.bfloat16)

    def pad_b(b, cols_to):
        return jnp.pad(b, (0, cols_to - b.shape[0])).reshape(1, cols_to).astype(jnp.float32)

    return (pad_w(w1, ip, hp), pad_b(b1, hp),
            pad_w(w2, hp, lp), pad_b(b2, lp),
            pad_w(w3, lp, hp), pad_b(b3, hp),
            pad_w(w4, hp, op), pad_b(b4, op))


# ----------------------------------------------------------------------------
# Pure-JAX references for correctness checks.
# ----------------------------------------------------------------------------
def reference_forward_f32(x, params):
    w1, b1, w2, b2, w3, b3, w4, b4 = params
    h1 = jax.nn.sigmoid(x @ w1 + b1)
    enc = jax.nn.sigmoid(h1 @ w2 + b2)
    h2 = jax.nn.sigmoid(enc @ w3 + b3)
    dec = jax.nn.sigmoid(h2 @ w4 + b4)
    return enc, dec


def reference_forward_bf16(x, params):
    """Mimics the kernel's precision chain (bf16 matmul inputs, f32 accum)."""
    w1, b1, w2, b2, w3, b3, w4, b4 = params

    def layer(a, w, b):
        return jax.nn.sigmoid(
            jnp.dot(a.astype(jnp.bfloat16), w.astype(jnp.bfloat16),
                    preferred_element_type=jnp.float32) + b)

    h1 = layer(x, w1, b1)
    enc = layer(h1, w2, b2)
    h2 = layer(enc, w3, b3)
    dec = layer(h2, w4, b4)
    return enc, dec


if __name__ == "__main__":
    # Small shapes consistent with the module's constructor signature.
    batch = 8
    input_dim = 32
    latent_dim = 16
    hidden_dim = 32
    output_dim = 32

    key = jax.random.PRNGKey(0)
    kx, kp = jax.random.split(key)

    x = jax.random.normal(kx, (batch, input_dim), jnp.float32)
    params = make_autoencoder_params(kp, input_dim, latent_dim, hidden_dim, output_dim)
    kparams = prepare_kernel_params(params)

    encoded, decoded = autoencoder_forward(
        x, kparams, latent_dim=latent_dim, output_dim=output_dim)
    encoded = jax.block_until_ready(encoded)
    decoded = jax.block_until_ready(decoded)

    assert encoded.shape == (batch, latent_dim)
    assert decoded.shape == (batch, output_dim)

    # Check against a reference that uses the same bf16/f32 precision chain.
    enc_bf, dec_bf = reference_forward_bf16(x, params)
    assert jnp.allclose(encoded, enc_bf, atol=5e-3), "encoded mismatch (bf16 ref)"
    assert jnp.allclose(decoded, dec_bf, atol=5e-3), "decoded mismatch (bf16 ref)"

    # Looser check against the full-f32 reference (bf16 matmul inputs => ~1e-3 abs err).
    enc_f32, dec_f32 = reference_forward_f32(x, params)
    assert jnp.allclose(encoded, enc_f32, atol=2e-2), "encoded mismatch (f32 ref)"
    assert jnp.allclose(decoded, dec_f32, atol=2e-2), "decoded mismatch (f32 ref)"

    print("KERNEL_OK")
</pallas_src>

<mosaic_0001>
module attributes {stable_mosaic.version = 11 : i64} {
  func.func @autoencoder_kernel(%arg0: i32, %arg1: memref<8x128xf32, #tpu.memory_space<vmem>>, %arg2: memref<128x128xbf16, #tpu.memory_space<vmem>>, %arg3: memref<1x128xf32, #tpu.memory_space<vmem>>, %arg4: memref<128x128xbf16, #tpu.memory_space<vmem>>, %arg5: memref<1x128xf32, #tpu.memory_space<vmem>>, %arg6: memref<128x128xbf16, #tpu.memory_space<vmem>>, %arg7: memref<1x128xf32, #tpu.memory_space<vmem>>, %arg8: memref<128x128xbf16, #tpu.memory_space<vmem>>, %arg9: memref<1x128xf32, #tpu.memory_space<vmem>>, %arg10: memref<8x128xf32, #tpu.memory_space<vmem>>, %arg11: memref<8x128xf32, #tpu.memory_space<vmem>>) attributes {dimension_semantics = [#tpu.dimension_semantics<parallel>], iteration_bounds = array<i64: 1>, scalar_prefetch = 0 : i64, scratch_operands = 0 : i64, tpu.core_type = #tpu.core_type<tc>, window_params = [{transform_indices = @transform_0, window_bounds = array<i64: 8, 128>}, {pipeline_mode = #tpu.pipeline_mode<synchronous>, transform_indices = @transform_1, window_bounds = array<i64: 128, 128>}, {pipeline_mode = #tpu.pipeline_mode<synchronous>, transform_indices = @transform_2, window_bounds = array<i64: 1, 128>}, {pipeline_mode = #tpu.pipeline_mode<synchronous>, transform_indices = @transform_3, window_bounds = array<i64: 128, 128>}, {pipeline_mode = #tpu.pipeline_mode<synchronous>, transform_indices = @transform_4, window_bounds = array<i64: 1, 128>}, {pipeline_mode = #tpu.pipeline_mode<synchronous>, transform_indices = @transform_5, window_bounds = array<i64: 128, 128>}, {pipeline_mode = #tpu.pipeline_mode<synchronous>, transform_indices = @transform_6, window_bounds = array<i64: 1, 128>}, {pipeline_mode = #tpu.pipeline_mode<synchronous>, transform_indices = @transform_7, window_bounds = array<i64: 128, 128>}, {pipeline_mode = #tpu.pipeline_mode<synchronous>, transform_indices = @transform_8, window_bounds = array<i64: 1, 128>}, {transform_indices = @transform_9, window_bounds = array<i64: 8, 128>}, {transform_indices = @transform_10, window_bounds = array<i64: 8, 128>}]} {
    %c0 = arith.constant 0 : index
    %c0_0 = arith.constant 0 : index
    %0 = vector.load %arg1[%c0, %c0_0] : memref<8x128xf32, #tpu.memory_space<vmem>>, vector<8x128xf32>
    %1 = arith.truncf %0 : vector<8x128xf32> to vector<8x128xbf16>
    %c0_1 = arith.constant 0 : index
    %c0_2 = arith.constant 0 : index
    %2 = vector.load %arg2[%c0_1, %c0_2] : memref<128x128xbf16, #tpu.memory_space<vmem>>, vector<128x128xbf16>
    %cst = arith.constant dense<0.000000e+00> : vector<8x128xf32>
    %3 = tpu.matmul %1, %2, %cst {dimension_numbers = #tpu.dot_dimension_numbers<[1], [0], [0], [1], [0, 0, 1, 1], [], []>} : vector<8x128xbf16>, vector<128x128xbf16>, vector<8x128xf32> -> vector<8x128xf32>
    %c0_3 = arith.constant 0 : index
    %c0_4 = arith.constant 0 : index
    %4 = vector.load %arg3[%c0_3, %c0_4] : memref<1x128xf32, #tpu.memory_space<vmem>>, vector<1x128xf32>
    %5 = vector.broadcast %4 : vector<1x128xf32> to vector<8x128xf32>
    %6 = arith.addf %3, %5 : vector<8x128xf32>
    %7 = arith.negf %6 : vector<8x128xf32>
    %8 = math.exp %7 : vector<8x128xf32>
    %cst_5 = arith.constant 1.000000e+00 : f32
    %9 = vector.broadcast %cst_5 : f32 to vector<8x128xf32>
    %10 = arith.addf %9, %8 : vector<8x128xf32>
    %11 = arith.divf %9, %10 : vector<8x128xf32>
    %12 = arith.truncf %11 : vector<8x128xf32> to vector<8x128xbf16>
    %c0_6 = arith.constant 0 : index
    %c0_7 = arith.constant 0 : index
    %13 = vector.load %arg4[%c0_6, %c0_7] : memref<128x128xbf16, #tpu.memory_space<vmem>>, vector<128x128xbf16>
    %cst_8 = arith.constant dense<0.000000e+00> : vector<8x128xf32>
    %14 = tpu.matmul %12, %13, %cst_8 {dimension_numbers = #tpu.dot_dimension_numbers<[1], [0], [0], [1], [0, 0, 1, 1], [], []>} : vector<8x128xbf16>, vector<128x128xbf16>, vector<8x128xf32> -> vector<8x128xf32>
    %c0_9 = arith.constant 0 : index
    %c0_10 = arith.constant 0 : index
    %15 = vector.load %arg5[%c0_9, %c0_10] : memref<1x128xf32, #tpu.memory_space<vmem>>, vector<1x128xf32>
    %16 = vector.broadcast %15 : vector<1x128xf32> to vector<8x128xf32>
    %17 = arith.addf %14, %16 : vector<8x128xf32>
    %18 = arith.negf %17 : vector<8x128xf32>
    %19 = math.exp %18 : vector<8x128xf32>
    %cst_11 = arith.constant 1.000000e+00 : f32
    %20 = vector.broadcast %cst_11 : f32 to vector<8x128xf32>
    %21 = arith.addf %20, %19 : vector<8x128xf32>
    %22 = arith.divf %20, %21 : vector<8x128xf32>
    %23 = arith.truncf %22 : vector<8x128xf32> to vector<8x128xbf16>
    %c0_12 = arith.constant 0 : index
    %c0_13 = arith.constant 0 : index
    %24 = vector.load %arg6[%c0_12, %c0_13] : memref<128x128xbf16, #tpu.memory_space<vmem>>, vector<128x128xbf16>
    %cst_14 = arith.constant dense<0.000000e+00> : vector<8x128xf32>
    %25 = tpu.matmul %23, %24, %cst_14 {dimension_numbers = #tpu.dot_dimension_numbers<[1], [0], [0], [1], [0, 0, 1, 1], [], []>} : vector<8x128xbf16>, vector<128x128xbf16>, vector<8x128xf32> -> vector<8x128xf32>
    %c0_15 = arith.constant 0 : index
    %c0_16 = arith.constant 0 : index
    %26 = vector.load %arg7[%c0_15, %c0_16] : memref<1x128xf32, #tpu.memory_space<vmem>>, vector<1x128xf32>
    %27 = vector.broadcast %26 : vector<1x128xf32> to vector<8x128xf32>
    %28 = arith.addf %25, %27 : vector<8x128xf32>
    %29 = arith.negf %28 : vector<8x128xf32>
    %30 = math.exp %29 : vector<8x128xf32>
    %cst_17 = arith.constant 1.000000e+00 : f32
    %31 = vector.broadcast %cst_17 : f32 to vector<8x128xf32>
    %32 = arith.addf %31, %30 : vector<8x128xf32>
    %33 = arith.divf %31, %32 : vector<8x128xf32>
    %34 = arith.truncf %33 : vector<8x128xf32> to vector<8x128xbf16>
    %c0_18 = arith.constant 0 : index
    %c0_19 = arith.constant 0 : index
    %35 = vector.load %arg8[%c0_18, %c0_19] : memref<128x128xbf16, #tpu.memory_space<vmem>>, vector<128x128xbf16>
    %cst_20 = arith.constant dense<0.000000e+00> : vector<8x128xf32>
    %36 = tpu.matmul %34, %35, %cst_20 {dimension_numbers = #tpu.dot_dimension_numbers<[1], [0], [0], [1], [0, 0, 1, 1], [], []>} : vector<8x128xbf16>, vector<128x128xbf16>, vector<8x128xf32> -> vector<8x128xf32>
    %c0_21 = arith.constant 0 : index
    %c0_22 = arith.constant 0 : index
    %37 = vector.load %arg9[%c0_21, %c0_22] : memref<1x128xf32, #tpu.memory_space<vmem>>, vector<1x128xf32>
    %38 = vector.broadcast %37 : vector<1x128xf32> to vector<8x128xf32>
    %39 = arith.addf %36, %38 : vector<8x128xf32>
    %40 = arith.negf %39 : vector<8x128xf32>
    %41 = math.exp %40 : vector<8x128xf32>
    %cst_23 = arith.constant 1.000000e+00 : f32
    %42 = vector.broadcast %cst_23 : f32 to vector<8x128xf32>
    %43 = arith.addf %42, %41 : vector<8x128xf32>
    %44 = arith.divf %42, %43 : vector<8x128xf32>
    %c0_24 = arith.constant 0 : index
    %c0_25 = arith.constant 0 : index
    %45 = vector.load %arg10[%c0_24, %c0_25] : memref<8x128xf32, #tpu.memory_space<vmem>>, vector<8x128xf32>
    tpu.vector_store %arg10[%c0_24, %c0_25], %22 {strides = array<i32>} : memref<8x128xf32, #tpu.memory_space<vmem>>, vector<8x128xf32>,
    %c0_26 = arith.constant 0 : index
    %c0_27 = arith.constant 0 : index
    %46 = vector.load %arg11[%c0_26, %c0_27] : memref<8x128xf32, #tpu.memory_space<vmem>>, vector<8x128xf32>
    tpu.vector_store %arg11[%c0_26, %c0_27], %44 {strides = array<i32>} : memref<8x128xf32, #tpu.memory_space<vmem>>, vector<8x128xf32>,
    return
  }
  func.func @transform_0(%arg0: i32) -> (i32, i32) {
    %c0_i32 = arith.constant 0 : i32
    %c0_i32_0 = arith.constant 0 : i32
    return %arg0, %c0_i32 : i32, i32
  }
  func.func @transform_1(%arg0: i32) -> (i32, i32) {
    %c0_i32 = arith.constant 0 : i32
    %c0_i32_0 = arith.constant 0 : i32
    %c0_i32_1 = arith.constant 0 : i32
    return %c0_i32, %c0_i32_0 : i32, i32
  }
  func.func @transform_2(%arg0: i32) -> (i32, i32) {
    %c0_i32 = arith.constant 0 : i32
    %c0_i32_0 = arith.constant 0 : i32
    %c0_i32_1 = arith.constant 0 : i32
    return %c0_i32, %c0_i32_0 : i32, i32
  }
  func.func @transform_3(%arg0: i32) -> (i32, i32) {
    %c0_i32 = arith.constant 0 : i32
    %c0_i32_0 = arith.constant 0 : i32
    %c0_i32_1 = arith.constant 0 : i32
    return %c0_i32, %c0_i32_0 : i32, i32
  }
  func.func @transform_4(%arg0: i32) -> (i32, i32) {
    %c0_i32 = arith.constant 0 : i32
    %c0_i32_0 = arith.constant 0 : i32
    %c0_i32_1 = arith.constant 0 : i32
    return %c0_i32, %c0_i32_0 : i32, i32
  }
  func.func @transform_5(%arg0: i32) -> (i32, i32) {
    %c0_i32 = arith.constant 0 : i32
    %c0_i32_0 = arith.constant 0 : i32
    %c0_i32_1 = arith.constant 0 : i32
    return %c0_i32, %c0_i32_0 : i32, i32
  }
  func.func @transform_6(%arg0: i32) -> (i32, i32) {
    %c0_i32 = arith.constant 0 : i32
    %c0_i32_0 = arith.constant 0 : i32
    %c0_i32_1 = arith.constant 0 : i32
    return %c0_i32, %c0_i32_0 : i32, i32
  }
  func.func @transform_7(%arg0: i32) -> (i32, i32) {
    %c0_i32 = arith.constant 0 : i32
    %c0_i32_0 = arith.constant 0 : i32
    %c0_i32_1 = arith.constant 0 : i32
    return %c0_i32, %c0_i32_0 : i32, i32
  }
  func.func @transform_8(%arg0: i32) -> (i32, i32) {
    %c0_i32 = arith.constant 0 : i32
    %c0_i32_0 = arith.constant 0 : i32
    %c0_i32_1 = arith.constant 0 : i32
    return %c0_i32, %c0_i32_0 : i32, i32
  }
  func.func @transform_9(%arg0: i32) -> (i32, i32) {
    %c0_i32 = arith.constant 0 : i32
    %c0_i32_0 = arith.constant 0 : i32
    return %arg0, %c0_i32 : i32, i32
  }
  func.func @transform_10(%arg0: i32) -> (i32, i32) {
    %c0_i32 = arith.constant 0 : i32
    %c0_i32_0 = arith.constant 0 : i32
    return %arg0, %c0_i32 : i32, i32
  }
}

</mosaic_0001>

<bundles_post_ra>
// kernel: autoencoder_forward.1
= control target key start
LH: loop header
LB: loop body
LE: loop exit
PB: predicated region body
PF: predicated region fallthrough
CT: control target
= control target key end

     0   :  { %16 = vsyncpa [#allocation3], 0  ;;  %s1172_s0 = inlined_call_operand.vmem [shape: f32[8,128], index: 0, kind: input, shape index: {}]   ;;  %s1173_s1 = inlined_call_operand.hbm [shape: bf16[128,128], index: 1, kind: input, shape index: {}]   ;;  %s1174_s2 = inlined_call_operand.vmem [shape: f32[1,128], index: 2, kind: input, shape index: {}]   ;;  %s1175_s3 = inlined_call_operand.hbm [shape: bf16[128,128], index: 3, kind: input, shape index: {}]   ;;  %s1176_s4 = inlined_call_operand.vmem [shape: f32[1,128], index: 4, kind: input, shape index: {}]   ;;  %s1177_s5 = inlined_call_operand.hbm [shape: bf16[128,128], index: 5, kind: input, shape index: {}]   ;;  %s1178_s6 = inlined_call_operand.vmem [shape: f32[1,128], index: 6, kind: input, shape index: {}]   ;;  %s1179_s7 = inlined_call_operand.hbm [shape: bf16[128,128], index: 7, kind: input, shape index: {}]   ;;  %s1180_s8 = inlined_call_operand.vmem [shape: f32[1,128], index: 8, kind: input, shape index: {}]   ;;  %s1181_s9 = inlined_call_operand.hbm [shape: f32[8,128], index: 9, kind: output, shape index: {0}]   ;;  %s1182_s10 = inlined_call_operand.hbm [shape: f32[8,128], index: 10, kind: output, shape index: {1}]  }
   0x1   :  { %17 = vsyncpa [#allocation6], 0 }
   0x2   :  { %18 = vsyncpa [#allocation9], 0 }
   0x3   :  { %19 = vsyncpa [#allocation4], 0 }
   0x4   :  { %20 = vsyncpa [#allocation12], 0  ;;  %s954_s13 = smov [#allocation5]   ;;  %s955_s15 = smov [#allocation2]  }
   0x5   :  { %s42_s14 = sshll.u32 %s954_s13, 4  ;;  %s28_s16 = sshll.u32 %s955_s15, 4  ;;  %s43_s14 = int_to_ptr.vmem [resolvable:$true] %s42_s14  ;;  %s1019_s16 = int_to_ptr.vmem [resolvable:$true] %s28_s16 }
   0x6   :  { %s812_s19 = scalar_lea.hbm %s1175_s3, 1024 }
   0x7   :  { %p813_p0 = scmp.ne.s32.totalorder %s1175_s3, %s812_s19  ;;  %p816_p1 = scmp.lt.u32.totalorder %s812_s19, %s1175_s3 }
   0x9   :  { %p818_p2 = pnand %p816_p1, %p813_p0 }
   0xb   :  { %821 = shalt.err (!%p818_p2)
}
   0xc   :  { %s822_s24 = scalar_lea.vmem %s43_s14, 1024  ;;  %p827_p4 = scmp.lt.s32.totalorder %s43_s14, %s43_s14 }
   0xd   :  { %p823_p3 = scmp.ne.s32.totalorder %s43_s14, %s822_s24  ;;  %p828_p5 = scmp.lt.s32.totalorder %s822_s24, %s822_s24 }
   0xf   :  { %p829_p6 = por %p828_p5, %p827_p4 }
  0x11   :  { %p830_p7 = pnand %p829_p6, %p823_p3 }
  0x13   :  { %833 = shalt.err (!%p830_p7)
}
  0x14   :  { %s956_s25 = smov 64   ;;  %s957_s26 = smov 4  }
  0x15   :  { %48 = dma.hbm_to_vmem [thread:$0]  %s1175_s3, 1024, %s43_s14, [#allocation6], %s956_s25, %s956_s25, %s957_s26  }
  0x16   :  { %s834_s11 = scalar_lea.hbm %s1173_s1, 1024 }
  0x17   :  { %p835_p8 = scmp.ne.s32.totalorder %s1173_s1, %s834_s11  ;;  %p838_p9 = scmp.lt.u32.totalorder %s834_s11, %s1173_s1 }
  0x19   :  { %p840_p10 = pnand %p838_p9, %p835_p8 }
  0x1b   :  { %843 = shalt.err (!%p840_p10)
}
  0x1c   :  { %s844_s18 = scalar_lea.vmem %s1019_s16, 1024  ;;  %p849_p12 = scmp.lt.s32.totalorder %s1019_s16, %s1019_s16 }
  0x1d   :  { %p845_p11 = scmp.ne.s32.totalorder %s1019_s16, %s844_s18  ;;  %p850_p13 = scmp.lt.s32.totalorder %s844_s18, %s844_s18 }
  0x1f   :  { %p851_p0 = por %p850_p13, %p849_p12 }
  0x21   :  { %p852_p1 = pnand %p851_p0, %p845_p11 }
  0x23   :  { %855 = shalt.err (!%p852_p1)
}
  0x24   :  { %34 = dma.hbm_to_vmem [thread:$0]  %s1173_s1, 1024, %s1019_s16, [#allocation3], %s956_s25, %s956_s25, %s957_s26  }
  0x25   :  { %s958_s19 = smov [#allocation7]   ;;  %s959_s21 = smov [#allocation8]  }
  0x26   :  { %s56_s20 = sshll.u32 %s958_s19, 4  ;;  %s70_s22 = sshll.u32 %s959_s21, 4  ;;  %s57_s20 = int_to_ptr.vmem [resolvable:$true] %s56_s20  ;;  %s1056_s22 = int_to_ptr.vmem [resolvable:$true] %s70_s22 }
  0x27   :  { %s856_s27 = scalar_lea.hbm %s1177_s5, 1024 }
  0x28   :  { %p857_p2 = scmp.ne.s32.totalorder %s1177_s5, %s856_s27  ;;  %p860_p3 = scmp.lt.u32.totalorder %s856_s27, %s1177_s5 }
  0x2a   :  { %p862_p4 = pnand %p860_p3, %p857_p2 }
  0x2c   :  { %865 = shalt.err (!%p862_p4)
}
  0x2d   :  { %s866_s1 = scalar_lea.vmem %s57_s20, 1024  ;;  %p871_p6 = scmp.lt.s32.totalorder %s57_s20, %s57_s20 }
  0x2e   :  { %p867_p5 = scmp.ne.s32.totalorder %s57_s20, %s866_s1  ;;  %p872_p7 = scmp.lt.s32.totalorder %s866_s1, %s866_s1 }
  0x30   :  { %p873_p8 = por %p872_p7, %p871_p6 }
  0x32   :  { %p874_p9 = pnand %p873_p8, %p867_p5 }
  0x34   :  { %877 = shalt.err (!%p874_p9)
}
  0x35   :  { %62 = dma.hbm_to_vmem [thread:$0]  %s1177_s5, 1024, %s57_s20, [#allocation6], %s956_s25, %s956_s25, %s957_s26  }
  0x36   :  { %s878_s17 = scalar_lea.hbm %s1179_s7, 1024 }
  0x37   :  { %p879_p10 = scmp.ne.s32.totalorder %s1179_s7, %s878_s17  ;;  %p882_p11 = scmp.lt.u32.totalorder %s878_s17, %s1179_s7 }
  0x39   :  { %p884_p12 = pnand %p882_p11, %p879_p10 }
  0x3b   :  { %887 = shalt.err (!%p884_p12)
}
  0x3c   :  { %s888_s21 = scalar_lea.vmem %s1056_s22, 1024  ;;  %p893_p0 = scmp.lt.s32.totalorder %s1056_s22, %s1056_s22 }
  0x3d   :  { %p889_p13 = scmp.ne.s32.totalorder %s1056_s22, %s888_s21  ;;  %p894_p1 = scmp.lt.s32.totalorder %s888_s21, %s888_s21 }
  0x3f   :  { %p895_p2 = por %p894_p1, %p893_p0 }
  0x41   :  { %p896_p3 = pnand %p895_p2, %p889_p13 }
  0x43   :  { %899 = shalt.err (!%p896_p3)
}
  0x44   :  { %76 = dma.hbm_to_vmem [thread:$0]  %s1179_s7, 1024, %s1056_s22, [#allocation9], %s956_s25, %s956_s25, %s957_s26  }
  0x45   :  { %944 = dma.done.wait [#allocation3], 1024  }
  0x46   :  { %945 = vsyncadd [#allocation3], 4294966272 }
  0x47   :  { %946 = dma.done.wait [#allocation6], 2048  }
  0x48   :  { %947 = vsyncadd [#allocation6], 4294965248 }
  0x49   :  { %948 = dma.done.wait [#allocation9], 1024  }
  0x4a   :  { %949 = vsyncadd [#allocation9], 4294966272  ;;  %v960_v0 = vmov 0.0   ;;  %vm961_vm0 = vmmov 0   ;;  %v764_v1 = vld [vmem:[#allocation2] sm:$0xff]   ;;  %v765_v2 = vld [vmem:[#allocation2 + $0x8] sm:$0xff]  }
  0x4b   :  { %674 = vmatprep.subr.bf16.mxu0 %v960_v0  ;;  %690 = vmatprep.mubr.msk.bf16.mxu0 %vm961_vm0, %v960_v0  ;;  %v766_v3 = vld [vmem:[#allocation2 + $0x10] sm:$0xff]   ;;  %v767_v4 = vld [vmem:[#allocation2 + $0x18] sm:$0xff]   ;;  %v768_v5 = vld [vmem:[#allocation2 + $0x20] sm:$0xff]   ;;  %s962_s24 = smov [#allocation10]  }
  0x4c   :  { %694 = vmatprep.subr.bf16.mxu1 %v960_v0  ;;  %710 = vmatprep.mubr.msk.bf16.mxu1 %vm961_vm0, %v960_v0  ;;  %v769_v6 = vld [vmem:[#allocation2 + $0x28] sm:$0xff]   ;;  %v770_v7 = vld [vmem:[#allocation2 + $0x30] sm:$0xff]   ;;  %v771_v8 = vld [vmem:[#allocation2 + $0x38] sm:$0xff]   ;;  %s573_s27 = sshll.u32 %s962_s24, 4  ;;  %s574_s27 = int_to_ptr.vmem [resolvable:$true] %s573_s27 }
  0x4d   :  { %675 = vmatpush3.bf16.msra.mxu0 %v764_v1  ;;  %v92_v9 = vld [vmem:[%s1172_s0] sm:$0xff]  ;;  %v772_v11 = vld [vmem:[#allocation5] sm:$0xff]   ;;  %v773_v12 = vld [vmem:[#allocation5 + $0x8] sm:$0xff]   ;;  %s900_s28 = scalar_lea.vmem %s574_s27, 128  ;;  %p905_p5 = scmp.lt.s32.totalorder %s574_s27, %s574_s27 }
  0x4e   :  { %676 = vmatprep.subr.bf16.mxu0 %v960_v0  ;;  %v93_v10 = vpack.c.bf16 %v92_v9, %v92_v9  ;;  %695 = vmatpush3.bf16.msra.mxu1 %v772_v11  ;;  %v774_v13 = vld [vmem:[#allocation5 + $0x10] sm:$0xff]   ;;  %v775_v14 = vld [vmem:[#allocation5 + $0x18] sm:$0xff]   ;;  %v776_v15 = vld [vmem:[#allocation5 + $0x20] sm:$0xff]   ;;  %p901_p4 = scmp.ne.s32.totalorder %s574_s27, %s900_s28  ;;  %p906_p6 = scmp.lt.s32.totalorder %s900_s28, %s900_s28 }
  0x4f   :  { %696 = vmatprep.subr.bf16.mxu1 %v960_v0  ;;  %v777_v16 = vld [vmem:[#allocation5 + $0x28] sm:$0xff]   ;;  %v778_v17 = vld [vmem:[#allocation5 + $0x30] sm:$0xff]   ;;  %v779_v18 = vld [vmem:[#allocation5 + $0x38] sm:$0xff]  }
  0x50   :  { %v598_v19 = vld [vmem:[%s1174_s2] ss:$0 sm:$0xff]  ;;  %v780_v30 = vld [vmem:[#allocation7] sm:$0xff]   ;;  %v781_v31 = vld [vmem:[#allocation7 + $0x8] sm:$0xff]   ;;  %p907_p7 = por %p906_p6, %p905_p5 }
  0x51   :  { %677 = vmatpush3.bf16.msra.mxu0 %v765_v2  ;;  %v782_v32 = vld [vmem:[#allocation7 + $0x10] sm:$0xff]   ;;  %v783_v33 = vld [vmem:[#allocation7 + $0x18] sm:$0xff]   ;;  %v784_v34 = vld [vmem:[#allocation7 + $0x20] sm:$0xff]  }
  0x52   :  { %678 = vmatprep.subr.bf16.mxu0 %v960_v0  ;;  %697 = vmatpush3.bf16.msra.mxu1 %v773_v12  ;;  %v785_v35 = vld [vmem:[#allocation7 + $0x28] sm:$0xff]   ;;  %v786_v36 = vld [vmem:[#allocation7 + $0x30] sm:$0xff]   ;;  %v787_v37 = vld [vmem:[#allocation7 + $0x38] sm:$0xff]   ;;  %p908_p8 = pnand %p907_p7, %p901_p4 }
  0x53   :  { %698 = vmatprep.subr.bf16.mxu1 %v960_v0  ;;  %v608_v38 = vld [vmem:[%s1176_s4] ss:$0 sm:$0xff]  ;;  %v788_v49 = vld [vmem:[#allocation8] sm:$0xff]   ;;  %v789_v50 = vld [vmem:[#allocation8 + $0x8] sm:$0xff]  }
  0x54   :  { %v790_v51 = vld [vmem:[#allocation8 + $0x10] sm:$0xff]   ;;  %v791_v52 = vld [vmem:[#allocation8 + $0x18] sm:$0xff]   ;;  %v792_v53 = vld [vmem:[#allocation8 + $0x20] sm:$0xff]  }
  0x55   :  { %679 = vmatpush3.bf16.msra.mxu0 %v766_v3  ;;  %v793_v54 = vld [vmem:[#allocation8 + $0x28] sm:$0xff]   ;;  %v794_v55 = vld [vmem:[#allocation8 + $0x30] sm:$0xff]   ;;  %v795_v56 = vld [vmem:[#allocation8 + $0x38] sm:$0xff]  }
  0x56   :  { %680 = vmatprep.subr.bf16.mxu0 %v960_v0  ;;  %699 = vmatpush3.bf16.msra.mxu1 %v774_v13  ;;  %v618_v57 = vld [vmem:[%s1178_s6] ss:$0 sm:$0xff] }
  0x57   :  { %700 = vmatprep.subr.bf16.mxu1 %v960_v0 }
  0x59   :  { %681 = vmatpush3.bf16.msra.mxu0 %v767_v4 }
  0x5a   :  { %682 = vmatprep.subr.bf16.mxu0 %v960_v0  ;;  %701 = vmatpush3.bf16.msra.mxu1 %v775_v14 }
  0x5b   :  { %702 = vmatprep.subr.bf16.mxu1 %v960_v0 }
  0x5d   :  { %683 = vmatpush3.bf16.msra.mxu0 %v768_v5 }
  0x5e   :  { %684 = vmatprep.subr.bf16.mxu0 %v960_v0  ;;  %703 = vmatpush3.bf16.msra.mxu1 %v776_v15 }
  0x5f   :  { %704 = vmatprep.subr.bf16.mxu1 %v960_v0 }
  0x61   :  { %685 = vmatpush3.bf16.msra.mxu0 %v769_v6 }
  0x62   :  { %686 = vmatprep.subr.bf16.mxu0 %v960_v0  ;;  %705 = vmatpush3.bf16.msra.mxu1 %v777_v16 }
  0x63   :  { %706 = vmatprep.subr.bf16.mxu1 %v960_v0 }
  0x65   :  { %687 = vmatpush3.bf16.msra.mxu0 %v770_v7 }
  0x66   :  { %688 = vmatprep.subr.bf16.mxu0 %v960_v0  ;;  %707 = vmatpush3.bf16.msra.mxu1 %v778_v17 }
  0x67   :  { %708 = vmatprep.subr.bf16.mxu1 %v960_v0 }
  0x69   :  { %689 = vmatpush3.bf16.msra.mxu0 %v771_v8 }
  0x6a   :  { %714 = vmatprep.subr.bf16.mxu0 %v960_v0  ;;  %709 = vmatpush3.bf16.msra.mxu1 %v779_v18 }
  0x6b   :  { %734 = vmatprep.subr.bf16.mxu1 %v960_v0 }
  0x6c   :  { %691 = vmatmul.mubr.bf16.vlgmr.msra.gmra.mrb[0].mxu0 %v93_v10 }
  0x6d   :  { %730 = vmatprep.mubr.msk.bf16.mxu0 %vm961_vm0, %v960_v0  ;;  %715 = vmatpush3.bf16.msra.mxu0 %v780_v30 }
  0x6e   :  { %716 = vmatprep.subr.bf16.mxu0 %v960_v0 }
  0x71   :  { %717 = vmatpush3.bf16.msra.mxu0 %v781_v31 }
  0x72   :  { %718 = vmatprep.subr.bf16.mxu0 %v960_v0 }
  0x75   :  { %719 = vmatpush3.bf16.msra.mxu0 %v782_v32 }
  0x76   :  { %720 = vmatprep.subr.bf16.mxu0 %v960_v0 }
  0x79   :  { %721 = vmatpush3.bf16.msra.mxu0 %v783_v33 }
  0x7a   :  { %722 = vmatprep.subr.bf16.mxu0 %v960_v0 }
  0x7d   :  { %723 = vmatpush3.bf16.msra.mxu0 %v784_v34 }
  0x7e   :  { %724 = vmatprep.subr.bf16.mxu0 %v960_v0 }
  0x81   :  { %725 = vmatpush3.bf16.msra.mxu0 %v785_v35 }
  0x82   :  { %726 = vmatprep.subr.bf16.mxu0 %v960_v0 }
  0x85   :  { %727 = vmatpush3.bf16.msra.mxu0 %v786_v36 }
  0x86   :  { %728 = vmatprep.subr.bf16.mxu0 %v960_v0 }
  0x89   :  { %729 = vmatpush3.bf16.msra.mxu0 %v787_v37 }
 0x13f   :  { %v199_v20 = vpop.f32.mrb[0].mxu0 }
 0x140   :  { %v200_v21 = vadd.f32 %v598_v19, %v199_v20  ;;  %v692_v22 = vpop.f32.mrb[1].mxu0 }
 0x141   :  { %v202_v23 = vpop.f32.mrb[2].mxu0 }
 0x142   :  { %v607_v24 = vmul.f32 -1.442695, %v200_v21  ;;  %v693_v25 = vpop.f32.mrb[3].mxu0 }
 0x144   :  { %796 = vpow2.f32 %v607_v24 }
 0x14e   :  { %v797_v26 = vpop.eup %796 }
 0x14f   :  { %v208_v27 = vadd.f32 1.0, %v797_v26 }
 0x151   :  { %798 = vrcp.f32 %v208_v27 }
 0x15b   :  { %v799_v28 = vpop.eup %798 }
 0x15c   :  { %v211_v29 = vpack.c.bf16 %v799_v28, %v799_v28 }
 0x15e   :  { %711 = vmatmul.mubr.bf16.vlgmr.msra.gmra.mrb[0].mxu1 %v211_v29 }
 0x15f   :  { %750 = vmatprep.mubr.msk.bf16.mxu1 %vm961_vm0, %v960_v0  ;;  %735 = vmatpush3.bf16.msra.mxu1 %v788_v49 }
 0x160   :  { %736 = vmatprep.subr.bf16.mxu1 %v960_v0 }
 0x163   :  { %737 = vmatpush3.bf16.msra.mxu1 %v789_v50 }
 0x164   :  { %738 = vmatprep.subr.bf16.mxu1 %v960_v0 }
 0x167   :  { %739 = vmatpush3.bf16.msra.mxu1 %v790_v51 }
 0x168   :  { %740 = vmatprep.subr.bf16.mxu1 %v960_v0 }
 0x16b   :  { %741 = vmatpush3.bf16.msra.mxu1 %v791_v52 }
 0x16c   :  { %742 = vmatprep.subr.bf16.mxu1 %v960_v0 }
 0x16f   :  { %743 = vmatpush3.bf16.msra.mxu1 %v792_v53 }
 0x170   :  { %744 = vmatprep.subr.bf16.mxu1 %v960_v0 }
 0x173   :  { %745 = vmatpush3.bf16.msra.mxu1 %v793_v54 }
 0x174   :  { %746 = vmatprep.subr.bf16.mxu1 %v960_v0 }
 0x177   :  { %747 = vmatpush3.bf16.msra.mxu1 %v794_v55 }
 0x178   :  { %748 = vmatprep.subr.bf16.mxu1 %v960_v0 }
 0x17b   :  { %749 = vmatpush3.bf16.msra.mxu1 %v795_v56 }
 0x231   :  { %v317_v39 = vpop.f32.mrb[0].mxu1 }
 0x232   :  { %v318_v40 = vadd.f32 %v608_v38, %v317_v39  ;;  %v712_v41 = vpop.f32.mrb[1].mxu1 }
 0x233   :  { %v320_v42 = vpop.f32.mrb[2].mxu1 }
 0x234   :  { %v617_v43 = vmul.f32 -1.442695, %v318_v40  ;;  %v713_v44 = vpop.f32.mrb[3].mxu1 }
 0x236   :  { %800 = vpow2.f32 %v617_v43 }
 0x240   :  { %v801_v45 = vpop.eup %800 }
 0x241   :  { %v326_v46 = vadd.f32 1.0, %v801_v45 }
 0x243   :  { %802 = vrcp.f32 %v326_v46 }
 0x24d   :  { %v803_v47 = vpop.eup %802 }
 0x24e   :  { %565 = vst [vmem:[#allocation10] sm:$0xff] %v803_v47  ;;  %v329_v48 = vpack.c.bf16 %v803_v47, %v803_v47 }
 0x250   :  { %731 = vmatmul.mubr.bf16.vlgmr.msra.gmra.mrb[4].mxu0 %v329_v48 }
 0x323   :  { %v435_v58 = vpop.f32.mrb[4].mxu0 }
 0x324   :  { %v436_v59 = vadd.f32 %v618_v57, %v435_v58  ;;  %v732_v60 = vpop.f32.mrb[5].mxu0 }
 0x325   :  { %v438_v61 = vpop.f32.mrb[6].mxu0 }
 0x326   :  { %v627_v62 = vmul.f32 -1.442695, %v436_v59  ;;  %v733_v63 = vpop.f32.mrb[7].mxu0 }
 0x328   :  { %804 = vpow2.f32 %v627_v62 }
 0x332   :  { %v805_v1 = vpop.eup %804 }
 0x333   :  { %v444_v2 = vadd.f32 1.0, %v805_v1 }
 0x335   :  { %806 = vrcp.f32 %v444_v2 }
 0x33f   :  { %v807_v3 = vpop.eup %806 }
 0x340   :  { %v447_v4 = vpack.c.bf16 %v807_v3, %v807_v3 }
 0x342   :  { %751 = vmatmul.mubr.bf16.vlgmr.msra.gmra.mrb[4].mxu1 %v447_v4 }
 0x343   :  { %911 = shalt.err (!%p908_p8)
}
 0x344   :  { %s912_s30 = scalar_lea.hbm %s1181_s9, 128 }
 0x345   :  { %p913_p9 = scmp.ne.s32.totalorder %s1181_s9, %s912_s30  ;;  %p916_p10 = scmp.lt.u32.totalorder %s912_s30, %s1181_s9 }
 0x347   :  { %p918_p11 = pnand %p916_p10, %p913_p9 }
 0x349   :  { %921 = shalt.err (!%p918_p11)
}
 0x34a   :  { %576 = dma.vmem_to_hbm [thread:$0]  %s574_s27, 128, %s1181_s9, [#allocation4]   ;;  %v628_v0 = vld [vmem:[%s1180_s8] ss:$0 sm:$0xff] }
 0x34b   :  { %s963_s3 = smov [#allocation11]  }
 0x34c   :  { %s583_s14 = sshll.u32 %s963_s3, 4  ;;  %s584_s14 = int_to_ptr.vmem [resolvable:$true] %s583_s14 }
 0x34d   :  { %s922_s9 = scalar_lea.vmem %s584_s14, 128  ;;  %p927_p13 = scmp.lt.s32.totalorder %s584_s14, %s584_s14 }
 0x34e   :  { %p923_p12 = scmp.ne.s32.totalorder %s584_s14, %s922_s9  ;;  %p928_p0 = scmp.lt.s32.totalorder %s922_s9, %s922_s9 }
 0x350   :  { %p929_p1 = por %p928_p0, %p927_p13 }
 0x352   :  { %p930_p2 = pnand %p929_p1, %p923_p12 }
 0x415   :  { %v553_v5 = vpop.f32.mrb[4].mxu1 }
 0x416   :  { %v554_v6 = vadd.f32 %v628_v0, %v553_v5  ;;  %v752_v7 = vpop.f32.mrb[5].mxu1 }
 0x417   :  { %v556_v8 = vpop.f32.mrb[6].mxu1 }
 0x418   :  { %v637_v9 = vmul.f32 -1.442695, %v554_v6  ;;  %v753_v10 = vpop.f32.mrb[7].mxu1 }
 0x41a   :  { %808 = vpow2.f32 %v637_v9 }
 0x424   :  { %v809_v11 = vpop.eup %808 }
 0x425   :  { %v562_v12 = vadd.f32 1.0, %v809_v11 }
 0x427   :  { %810 = vrcp.f32 %v562_v12 }
 0x431   :  { %v811_v13 = vpop.eup %810 }
 0x432   :  { %566 = vst [vmem:[#allocation11] sm:$0xff] %v811_v13 }
 0x433   :  { %933 = shalt.err (!%p930_p2)
}
 0x434   :  { %s934_s21 = scalar_lea.hbm %s1182_s10, 128 }
 0x435   :  { %p935_p3 = scmp.ne.s32.totalorder %s1182_s10, %s934_s21  ;;  %p938_p4 = scmp.lt.u32.totalorder %s934_s21, %s1182_s10 }
 0x437   :  { %p940_p5 = pnand %p938_p4, %p935_p3 }
 0x439   :  { %943 = shalt.err (!%p940_p5)
}
 0x43a   :  { %586 = dma.vmem_to_hbm [thread:$0]  %s584_s14, 128, %s1182_s10, [#allocation12]  }
 0x43b   :  { %950 = dma.done.wait [#allocation4], 128  }
 0x43c   :  { %951 = vsyncadd [#allocation4], 4294967168 }
 0x43d   :  { %952 = dma.done.wait [#allocation12], 128  }
 0x43e   :  { %953 = vsyncadd [#allocation12], 4294967168 }
 0x43f   :  { %593 = vsyncpa [#allocation3], 1 }
 0x440   :  { %594 = vsyncpa [#allocation6], 1 }
 0x441   :  { %595 = vsyncpa [#allocation9], 1 }
 0x442   :  { %596 = vsyncpa [#allocation4], 1 }
 0x443   :  { %597 = vsyncpa [#allocation12], 1 }

</bundles_post_ra>
